<compile_context>
chip_gen: v7x
topology: tpu7x:2x2x1
jax: 0.10.0
libtpu: 0.0.40
codegen_flags: <defaults>
</compile_context>

<pallas_src>
import jax
import jax.numpy as jnp
from jax import lax
from jax.experimental import pallas as pl
from jax.experimental.pallas import tpu as pltpu

_LANE = 128


def _upsample_kernel(unknown_t_ref, known_ref, feats_ref, o_ref, minv_ref, acc_ref):
    # unknown_t_ref: (1, 3, TILE_N)      xyz of unknown points (transposed, lane = points)
    # known_ref:     (1, TILE_M, 3)      xyz of known points for this m-block
    # feats_ref:     (1, C, TILE_M)      features of known points (native dtype)
    # o_ref:         (1, C, TILE_N)      gathered features for this n-tile
    # minv_ref:      (1, TILE_N) f32     running min squared distance (scratch)
    # acc_ref:       (C, TILE_N) f32     running best features (scratch)
    mj = pl.program_id(2)

    @pl.when(mj == 0)
    def _init():
        minv_ref[...] = jnp.full(minv_ref.shape, jnp.inf, jnp.float32)
        acc_ref[...] = jnp.zeros_like(acc_ref)

    ut = unknown_t_ref[0].astype(jnp.float32)        # (3, TILE_N)
    k = known_ref[0].astype(jnp.float32)             # (TILE_M, 3)
    f = feats_ref[0]                                 # (C, TILE_M), native dtype (no upcast)

    tile_m = k.shape[0]
    tile_n = ut.shape[1]

    # u components as (1, TILE_N) rows, k components as (TILE_M, 1) columns.
    ux = ut[0:1, :]
    uy = ut[1:2, :]
    uz = ut[2:3, :]
    kx = k[:, 0:1]
    ky = k[:, 1:2]
    kz = k[:, 2:3]

    # Squared distance, transposed orientation (TILE_M, TILE_N), pure VPU work.
    dx = kx - ux
    dy = ky - uy
    dz = kz - uz
    d2 = dx * dx + dy * dy + dz * dz                 # (TILE_M, TILE_N)

    # Local (within this m-block) nearest index per unknown point; first index on ties.
    lmin = jnp.min(d2, axis=0, keepdims=True)        # (1, TILE_N)
    row = lax.broadcasted_iota(jnp.int32, (tile_m, tile_n), 0)
    lidx = jnp.min(jnp.where(d2 <= lmin, row, tile_m), axis=0, keepdims=True)

    # One-hot already in (TILE_M, TILE_N) orientation, native feats dtype:
    # gather = f (C, TILE_M) @ onehot (TILE_M, TILE_N) on the MXU, no transpose.
    onehot = (row == lidx).astype(f.dtype)
    cand = jnp.dot(f, onehot, preferred_element_type=jnp.float32)   # (C, TILE_N)

    # Running selection across m-blocks (strict < keeps the earlier block on ties,
    # i.e. global first-index argmin semantics).
    better = lmin < minv_ref[...]                    # (1, TILE_N)
    minv_ref[...] = jnp.where(better, lmin, minv_ref[...])
    acc_ref[...] = jnp.where(better, cand, acc_ref[...])

    @pl.when(mj == pl.num_programs(2) - 1)
    def _finalize():
        o_ref[0] = acc_ref[...].astype(o_ref.dtype)


def _round_up(x, a):
    return (x + a - 1) // a * a


def _choose_tiles(n, m, C, feat_bytes, out_bytes, budget_bytes=24 * 1024 * 1024):
    """VMEM-budget-driven tile choice (fits v5e/v6e/v7x scoped VMEM comfortably)."""
    # m tiling: single block for small m, otherwise 512-wide blocks.
    if m <= 1024:
        tile_m, m_pad = m, m
    else:
        tile_m = 512
        m_pad = _round_up(m, tile_m)

    def est(tile_n):
        feats_blk = 2 * C * tile_m * feat_bytes          # double-buffered feats block
        known_blk = 2 * tile_m * _LANE * 4               # lane-padded (TILE_M, 3) f32 block
        unk_blk = 2 * 8 * tile_n * 4                     # sublane-padded (3, TILE_N) block
        out_blk = 2 * C * tile_n * out_bytes             # output double buffer
        scratch = (8 + C) * tile_n * 4                   # minv + acc scratch
        interm = 6 * tile_m * tile_n * 4                 # d2 / iota / onehot / cand / masks
        return feats_blk + known_blk + unk_blk + out_blk + scratch + interm

    tile_n = _LANE
    for cand in (1024, 512, 256, 128):
        if est(cand) <= budget_bytes:
            tile_n = cand
            break
    n_pad = _round_up(max(n, tile_n), tile_n)
    return tile_n, n_pad, tile_m, m_pad


def upsample_nn_interpolate(unknown, known, known_feats):
    """pointnet2 UpSample forward.

    unknown:     (B, n, 3)  xyz of the points to propagate features to
    known:       (B, m, 3)  xyz of the points carrying features
    known_feats: (B, C, m)  features of the known points
    returns      (B, C, n)  nearest-neighbor interpolated features
    """
    B, n, _ = unknown.shape
    _, m, _ = known.shape
    _, C, _ = known_feats.shape

    feat_bytes = known_feats.dtype.itemsize
    out_dtype = known_feats.dtype
    tile_n, n_pad, tile_m, m_pad = _choose_tiles(n, m, C, feat_bytes, out_dtype.itemsize)

    # Pad m (if tiled) with duplicates of the first known point; duplicates can
    # never win over the original (strict-< across blocks) and carry identical
    # features, so semantics are preserved.
    if m_pad > m:
        pad_k = jnp.broadcast_to(known[:, :1, :], (B, m_pad - m, 3))
        known = jnp.concatenate([known, pad_k], axis=1)
        pad_f = jnp.broadcast_to(known_feats[:, :, :1], (B, C, m_pad - m))
        known_feats = jnp.concatenate([known_feats, pad_f], axis=2)

    # Transpose unknown to (B, 3, n_pad) so the point axis is the lane axis;
    # pad n up to a multiple of TILE_N (padded columns are discarded later).
    unknown_t = jnp.transpose(unknown, (0, 2, 1))
    if n_pad > n:
        unknown_t = jnp.pad(unknown_t, ((0, 0), (0, 0), (0, n_pad - n)))

    grid = (B, n_pad // tile_n, m_pad // tile_m)

    flops = 8 * B * n_pad * m_pad + 2 * B * C * n_pad * m_pad
    n_tiles = grid[1]
    bytes_accessed = (
        B * 3 * n_pad * 4
        + n_tiles * (B * m_pad * 3 * 4 + B * C * m_pad * feat_bytes)
        + B * C * n_pad * out_dtype.itemsize
    )

    out = pl.pallas_call(
        _upsample_kernel,
        out_shape=jax.ShapeDtypeStruct((B, C, n_pad), out_dtype),
        grid_spec=pltpu.PrefetchScalarGridSpec(
            num_scalar_prefetch=0,
            grid=grid,
            in_specs=[
                pl.BlockSpec((1, 3, tile_n), lambda b, i, j: (b, 0, i)),
                pl.BlockSpec((1, tile_m, 3), lambda b, i, j: (b, j, 0)),
                pl.BlockSpec((1, C, tile_m), lambda b, i, j: (b, 0, j)),
            ],
            out_specs=pl.BlockSpec((1, C, tile_n), lambda b, i, j: (b, 0, i)),
            scratch_shapes=[
                pltpu.VMEM((1, tile_n), jnp.float32),
                pltpu.VMEM((C, tile_n), jnp.float32),
            ],
        ),
        compiler_params=pltpu.CompilerParams(
            dimension_semantics=("parallel", "parallel", "arbitrary"),
            vmem_limit_bytes=48 * 1024 * 1024,
        ),
        cost_estimate=pl.CostEstimate(
            flops=int(flops), transcendentals=0, bytes_accessed=int(bytes_accessed)),
    )(unknown_t, known, known_feats)

    return out[:, :, :n]


if __name__ == "__main__":
    key = jax.random.PRNGKey(0)
    k1, k2, k3 = jax.random.split(key, 3)
    B, n, m, C = 2, 16, 8, 4
    unknown = jax.random.normal(k1, (B, n, 3), dtype=jnp.float32)
    known = jax.random.normal(k2, (B, m, 3), dtype=jnp.float32)
    known_feats = jax.random.normal(k3, (B, C, m), dtype=jnp.float32)

    out = upsample_nn_interpolate(unknown, known, known_feats)
    out = jax.block_until_ready(out)

    # Pure-JAX reference: nearest known neighbor per unknown point, then gather.
    d2 = jnp.sum((unknown[:, :, None, :] - known[:, None, :, :]) ** 2, axis=-1)  # (B,n,m)
    idx = jnp.argmin(d2, axis=-1)                                                # (B,n)
    ref = jnp.take_along_axis(
        known_feats, jnp.broadcast_to(idx[:, None, :], (B, C, n)), axis=2)       # (B,C,n)

    assert out.shape == (B, C, n)
    assert jnp.allclose(out, ref, atol=1e-5, rtol=1e-5), "mismatch vs reference"
    print("KERNEL_OK")
</pallas_src>

<mosaic_0001>
module attributes {stable_mosaic.version = 11 : i64} {
  func.func @_upsample_kernel(%arg0: i32, %arg1: i32, %arg2: i32, %arg3: memref<1x3x1024xf32, #tpu.memory_space<vmem>>, %arg4: memref<1x8x3xf32, #tpu.memory_space<vmem>>, %arg5: memref<1x4x8xf32, #tpu.memory_space<vmem>>, %arg6: memref<1x4x1024xf32, #tpu.memory_space<vmem>>, %arg7: memref<1x1024xf32, #tpu.memory_space<vmem>>, %arg8: memref<4x1024xf32, #tpu.memory_space<vmem>>) attributes {dimension_semantics = [#tpu.dimension_semantics<parallel>, #tpu.dimension_semantics<parallel>, #tpu.dimension_semantics<arbitrary>], iteration_bounds = array<i64: 2, 1, 1>, scalar_prefetch = 0 : i64, scratch_operands = 2 : i64, tpu.core_type = #tpu.core_type<tc>, window_params = [{transform_indices = @transform_0, window_bounds = array<i64: 1, 3, 1024>}, {transform_indices = @transform_1, window_bounds = array<i64: 1, 8, 3>}, {transform_indices = @transform_2, window_bounds = array<i64: 1, 4, 8>}, {transform_indices = @transform_3, window_bounds = array<i64: 1, 4, 1024>}]} {
    %c0_i32 = arith.constant 0 : i32
    %0 = arith.cmpi eq, %arg2, %c0_i32 : i32
    %1 = arith.extui %0 : i1 to i32
    %c0_i32_0 = arith.constant 0 : i32
    %2 = arith.cmpi ne, %1, %c0_i32_0 : i32
    scf.if %2 {
      %cst_23 = arith.constant 0x7F800000 : f32
      %56 = vector.broadcast %cst_23 : f32 to vector<1x1024xf32>
      %c0_24 = arith.constant 0 : index
      %c0_25 = arith.constant 0 : index
      %57 = vector.load %arg7[%c0_24, %c0_25] : memref<1x1024xf32, #tpu.memory_space<vmem>>, vector<1x1024xf32>
      tpu.vector_store %arg7[%c0_24, %c0_25], %56 {strides = array<i32>} : memref<1x1024xf32, #tpu.memory_space<vmem>>, vector<1x1024xf32>,
      %cst_26 = arith.constant 0.000000e+00 : f32
      %58 = vector.broadcast %cst_26 : f32 to vector<4x1024xf32>
      %c0_27 = arith.constant 0 : index
      %c0_28 = arith.constant 0 : index
      %59 = vector.load %arg8[%c0_27, %c0_28] : memref<4x1024xf32, #tpu.memory_space<vmem>>, vector<4x1024xf32>
      tpu.vector_store %arg8[%c0_27, %c0_28], %58 {strides = array<i32>} : memref<4x1024xf32, #tpu.memory_space<vmem>>, vector<4x1024xf32>,
    } else {
    }
    %c0 = arith.constant 0 : index
    %c0_1 = arith.constant 0 : index
    %c0_2 = arith.constant 0 : index
    %3 = vector.load %arg3[%c0, %c0_1, %c0_2] : memref<1x3x1024xf32, #tpu.memory_space<vmem>>, vector<1x3x1024xf32>
    %4 = vector.shape_cast %3 : vector<1x3x1024xf32> to vector<3x1024xf32>
    %c0_3 = arith.constant 0 : index
    %c0_4 = arith.constant 0 : index
    %c0_5 = arith.constant 0 : index
    %5 = vector.load %arg4[%c0_3, %c0_4, %c0_5] : memref<1x8x3xf32, #tpu.memory_space<vmem>>, vector<1x8x3xf32>
    %6 = vector.shape_cast %5 : vector<1x8x3xf32> to vector<8x3xf32>
    %c0_6 = arith.constant 0 : index
    %c0_7 = arith.constant 0 : index
    %c0_8 = arith.constant 0 : index
    %7 = vector.load %arg5[%c0_6, %c0_7, %c0_8] : memref<1x4x8xf32, #tpu.memory_space<vmem>>, vector<1x4x8xf32>
    %8 = vector.shape_cast %7 : vector<1x4x8xf32> to vector<4x8xf32>
    %9 = vector.extract_strided_slice %4 {offsets = [0, 0], sizes = [1, 1024], strides = [1, 1]} : vector<3x1024xf32> to vector<1x1024xf32>
    %10 = vector.extract_strided_slice %4 {offsets = [1, 0], sizes = [1, 1024], strides = [1, 1]} : vector<3x1024xf32> to vector<1x1024xf32>
    %11 = vector.extract_strided_slice %4 {offsets = [2, 0], sizes = [1, 1024], strides = [1, 1]} : vector<3x1024xf32> to vector<1x1024xf32>
    %12 = vector.extract_strided_slice %6 {offsets = [0, 0], sizes = [8, 1], strides = [1, 1]} : vector<8x3xf32> to vector<8x1xf32>
    %13 = vector.extract_strided_slice %6 {offsets = [0, 1], sizes = [8, 1], strides = [1, 1]} : vector<8x3xf32> to vector<8x1xf32>
    %14 = vector.extract_strided_slice %6 {offsets = [0, 2], sizes = [8, 1], strides = [1, 1]} : vector<8x3xf32> to vector<8x1xf32>
    %15 = vector.broadcast %12 : vector<8x1xf32> to vector<8x1024xf32>
    %16 = vector.broadcast %9 : vector<1x1024xf32> to vector<8x1024xf32>
    %17 = arith.subf %15, %16 : vector<8x1024xf32>
    %18 = vector.broadcast %13 : vector<8x1xf32> to vector<8x1024xf32>
    %19 = vector.broadcast %10 : vector<1x1024xf32> to vector<8x1024xf32>
    %20 = arith.subf %18, %19 : vector<8x1024xf32>
    %21 = vector.broadcast %14 : vector<8x1xf32> to vector<8x1024xf32>
    %22 = vector.broadcast %11 : vector<1x1024xf32> to vector<8x1024xf32>
    %23 = arith.subf %21, %22 : vector<8x1024xf32>
    %24 = arith.mulf %17, %17 : vector<8x1024xf32>
    %25 = arith.mulf %20, %20 : vector<8x1024xf32>
    %26 = arith.addf %24, %25 : vector<8x1024xf32>
    %27 = arith.mulf %23, %23 : vector<8x1024xf32>
    %28 = arith.addf %26, %27 : vector<8x1024xf32>
    %cst = arith.constant dense<0x7F800000> : vector<1024xf32>
    %29 = vector.multi_reduction <minimumf>, %28, %cst [0] : vector<8x1024xf32> to vector<1024xf32>
    %30 = vector.shape_cast %29 : vector<1024xf32> to vector<1x1024xf32>
    %31 = tpu.iota {dimensions = array<i32: 0>} : vector<8x1024xi32>
    %32 = vector.broadcast %30 : vector<1x1024xf32> to vector<8x1024xf32>
    %33 = arith.cmpf ole, %28, %32 : vector<8x1024xf32>
    %c8_i32 = arith.constant 8 : i32
    %34 = vector.broadcast %c8_i32 : i32 to vector<8x1024xi32>
    %35 = arith.select %33, %31, %34 : vector<8x1024xi1>, vector<8x1024xi32>
    %cst_9 = arith.constant dense<2147483647> : vector<1024xi32>
    %36 = vector.multi_reduction <minsi>, %35, %cst_9 [0] : vector<8x1024xi32> to vector<1024xi32>
    %37 = vector.shape_cast %36 : vector<1024xi32> to vector<1x1024xi32>
    %38 = vector.broadcast %37 : vector<1x1024xi32> to vector<8x1024xi32>
    %39 = arith.cmpi eq, %31, %38 : vector<8x1024xi32>
    %40 = arith.extui %39 : vector<8x1024xi1> to vector<8x1024xi32>
    %41 = arith.sitofp %40 : vector<8x1024xi32> to vector<8x1024xf32>
    %cst_10 = arith.constant dense<0.000000e+00> : vector<4x1024xf32>
    %42 = tpu.matmul %8, %41, %cst_10 {dimension_numbers = #tpu.dot_dimension_numbers<[1], [0], [0], [1], [0, 0, 1, 1], [], []>} : vector<4x8xf32>, vector<8x1024xf32>, vector<4x1024xf32> -> vector<4x1024xf32>
    %c0_11 = arith.constant 0 : index
    %c0_12 = arith.constant 0 : index
    %43 = vector.load %arg7[%c0_11, %c0_12] : memref<1x1024xf32, #tpu.memory_space<vmem>>, vector<1x1024xf32>
    %44 = arith.cmpf olt, %30, %43 : vector<1x1024xf32>
    %c0_13 = arith.constant 0 : index
    %c0_14 = arith.constant 0 : index
    %45 = vector.load %arg7[%c0_13, %c0_14] : memref<1x1024xf32, #tpu.memory_space<vmem>>, vector<1x1024xf32>
    %46 = arith.select %44, %30, %45 : vector<1x1024xi1>, vector<1x1024xf32>
    %c0_15 = arith.constant 0 : index
    %c0_16 = arith.constant 0 : index
    %47 = vector.load %arg7[%c0_15, %c0_16] : memref<1x1024xf32, #tpu.memory_space<vmem>>, vector<1x1024xf32>
    tpu.vector_store %arg7[%c0_15, %c0_16], %46 {strides = array<i32>} : memref<1x1024xf32, #tpu.memory_space<vmem>>, vector<1x1024xf32>,
    %c0_17 = arith.constant 0 : index
    %c0_18 = arith.constant 0 : index
    %48 = vector.load %arg8[%c0_17, %c0_18] : memref<4x1024xf32, #tpu.memory_space<vmem>>, vector<4x1024xf32>
    %49 = vector.shape_cast %44 : vector<1x1024xi1> to vector<1x1024xi1>
    %50 = vector.broadcast %49 : vector<1x1024xi1> to vector<4x1024xi1>
    %51 = arith.select %50, %42, %48 : vector<4x1024xi1>, vector<4x1024xf32>
    %c0_19 = arith.constant 0 : index
    %c0_20 = arith.constant 0 : index
    %52 = vector.load %arg8[%c0_19, %c0_20] : memref<4x1024xf32, #tpu.memory_space<vmem>>, vector<4x1024xf32>
    tpu.vector_store %arg8[%c0_19, %c0_20], %51 {strides = array<i32>} : memref<4x1024xf32, #tpu.memory_space<vmem>>, vector<4x1024xf32>,
    %c0_i32_21 = arith.constant 0 : i32
    %53 = arith.cmpi eq, %arg2, %c0_i32_21 : i32
    %54 = arith.extui %53 : i1 to i32
    %c0_i32_22 = arith.constant 0 : i32
    %55 = arith.cmpi ne, %54, %c0_i32_22 : i32
    scf.if %55 {
      %c0_23 = arith.constant 0 : index
      %c0_24 = arith.constant 0 : index
      %56 = vector.load %arg8[%c0_23, %c0_24] : memref<4x1024xf32, #tpu.memory_space<vmem>>, vector<4x1024xf32>
      %c0_25 = arith.constant 0 : index
      %c0_26 = arith.constant 0 : index
      %c0_27 = arith.constant 0 : index
      %57 = vector.load %arg6[%c0_25, %c0_26, %c0_27] : memref<1x4x1024xf32, #tpu.memory_space<vmem>>, vector<1x4x1024xf32>
      %58 = vector.shape_cast %57 : vector<1x4x1024xf32> to vector<4x1024xf32>
      %59 = vector.shape_cast %56 : vector<4x1024xf32> to vector<1x4x1024xf32>
      tpu.vector_store %arg6[%c0_25, %c0_26, %c0_27], %59 {strides = array<i32>} : memref<1x4x1024xf32, #tpu.memory_space<vmem>>, vector<1x4x1024xf32>,
    } else {
    }
    return
  }
  func.func @transform_0(%arg0: i32, %arg1: i32, %arg2: i32) -> (i32, i32, i32) {
    %c0_i32 = arith.constant 0 : i32
    %c0_i32_0 = arith.constant 0 : i32
    return %arg0, %c0_i32, %arg1 : i32, i32, i32
  }
  func.func @transform_1(%arg0: i32, %arg1: i32, %arg2: i32) -> (i32, i32, i32) {
    %c0_i32 = arith.constant 0 : i32
    %c0_i32_0 = arith.constant 0 : i32
    return %arg0, %arg2, %c0_i32 : i32, i32, i32
  }
  func.func @transform_2(%arg0: i32, %arg1: i32, %arg2: i32) -> (i32, i32, i32) {
    %c0_i32 = arith.constant 0 : i32
    %c0_i32_0 = arith.constant 0 : i32
    return %arg0, %c0_i32, %arg2 : i32, i32, i32
  }
  func.func @transform_3(%arg0: i32, %arg1: i32, %arg2: i32) -> (i32, i32, i32) {
    %c0_i32 = arith.constant 0 : i32
    %c0_i32_0 = arith.constant 0 : i32
    return %arg0, %c0_i32, %arg1 : i32, i32, i32
  }
}

</mosaic_0001>

<bundles_post_ra>
// kernel: tpu_custom_call.1
= control target key start
LH: loop header
LB: loop body
LE: loop exit
PB: predicated region body
PF: predicated region fallthrough
CT: control target
= control target key end

     0   :  { %8 = vsyncpa [#allocation5], 0  ;;  %s1916_s0 = inlined_call_operand.vmem [shape: f32[2,3,1024], index: 0, kind: input, shape index: {}]   ;;  %s1917_s1 = inlined_call_operand.vmem [shape: f32[2,8,3], index: 1, kind: input, shape index: {}]   ;;  %s1918_s2 = inlined_call_operand.vmem [shape: f32[2,4,8], index: 2, kind: input, shape index: {}]   ;;  %s1919_s3 = inlined_call_operand.hbm [shape: f32[2,4,1024], index: 3, kind: output, shape index: {}]  }
   0x1   :  { %10 = vsyncpa [#allocation5 + $0x1], 0  ;;  %s1580_s12 = smov 0   ;;  %s1582_s13 = smov 0  }
   0x2   :  { %s1584_s14 = smov 0   ;;  %s1586_s15 = smov 0  }
   0x3   :  { %s1588_s16 = smov 0   ;;  %s1590_s17 = smov 0  }
   0x4 LB: > { %s1371_s18 = sadd.s32 4294967295, %s1551_s17   ;;  %s1372_s19 = sadd.s32 4294967294, %s1551_s17   ;;  %s1551_s17 = sphi %s1590_s17, %s16_s17   ;;  %s1547_s16 = sphi %s1588_s16, %s1928_s16   ;;  %s1543_s15 = sphi %s1586_s15, %s1927_s15   ;;  %s1539_s14 = sphi %s1584_s14, %s1926_s14   ;;  %s1535_s13 = sphi %s1582_s13, %s1925_s13   ;;  %s1531_s12 = sphi %s1580_s12, %s1924_s12  }
   0x5   : > { %s35_s20 = sadd.s32 1, %s1547_s16  ;;  %s128_s21 = sadd.s32 1, %s1539_s14 }
   0x6   : > { %p37_p0 = scmp.ge.s32.totalorder %s35_s20, 2  ;;  %p138_p1 = scmp.ne.s32.totalorder %s1539_s14, %s1535_s13 }
   0x7   : > { %p139_p2 = scmp.eq.s32.totalorder %s1371_s18, 1  ;;  %p144_p3 = scmp.ne.s32.totalorder %s1535_s13, %s1531_s12 }
   0x8   : > { %s1930_s20 = smov (%p37_p0, %s35_s20), 0  ;;  %p145_p5 = scmp.eq.s32.totalorder %s1372_s19, 1 }
   0x9   : > { %p1620_p4 = por %p139_p2, %p138_p1  ;;  %s123_s23 = ssub.s32 %s1547_s16, %s1930_s20 }
   0xa   : > { %p1375_p6 = scmp.ge.s32.totalorder %s1551_s17, 1  ;;  %p126_p7 = scmp.eq.s32.totalorder %s123_s23, 0 }
   0xb   : > { %p1627_p8 = por %p145_p5, %p144_p3  ;;  %p196_p9 = scmp.lt.s32.totalorder %s1551_s17, 3 }
   0xc   : > { %s1633_s25 = scalar_select %p126_p7, %s1539_s14, %s128_s21  }
   0xd   : > { %p197_p10 = pnand %p1375_p6, %p196_p9 }
   0xe   : > { %p239_p11 = scmp.lt.s32.totalorder (!%p197_p10), %s1543_s15, 1  ;;  %v1553_v0 = vmov (!%p197_p10), 0   ;;  %v1554_v1 = vmov (!%p197_p10), 2   ;;  %v1555_v3 = vmov (!%p197_p10), 1   ;;  %v1556_v4 = vmov (!%p197_p10), 0.0   ;;  %s235_s18 = sand.u32 (!%p197_p10), 1, %s1535_s13  }
   0xf   : > { %200 = sbr.rel (%p197_p10) target bundleno = 446 (0x1be), region = 32  ;;  %1469 = vset.pattern.permute.xlu0 (!%p197_p10), %v1553_v0  ;;  %1471 = vset.pattern.permute.xlu1 (!%p197_p10), %v1554_v1  ;;  %v287_v5 = vlaneseq (!%p197_p10)  ;;  %vm737_vm15 = vcmask (!%p197_p10), 64512   ;;  %s1376_s19 = sshll.u32 (!%p197_p10), %s235_s18, 5 }
  0x10   : > { %805 = vmatprep.mubr.f32.mxu0 (!%p197_p10), %v1556_v4  ;;  %876 = vmatprep.mubr.f32.mxu1 (!%p197_p10), %v1556_v4  ;;  %s237_s21 = scalar_lea.vmem (!%p197_p10), [#allocation4], %s1376_s19  ;;  %s1407_s23 = sshll.u32 (!%p197_p10), %s1543_s15, 9 }
  0x11   : > { %v1647_v6 = vshrl.u32 (!%p197_p10), %v287_v5, 7  ;;  %s1867_s29 = scalar_lea.hbm (!%p197_p10), %s1919_s3, %s1407_s23 }
  0x13   : > { %v1653_v7 = vsub.s32 (!%p197_p10), 0, %v1647_v6  ;;  %v1656_v9 = vsub.s32 (!%p197_p10), 4, %v1647_v6  ;;  %v1659_v11 = vsub.s32 (!%p197_p10), 1, %v1647_v6  ;;  %v1662_v12 = vsub.s32 (!%p197_p10), 5, %v1647_v6 }
  0x14   : > { %v1673_v23 = vsub.s32 (!%p197_p10), 2, %v1647_v6  ;;  %v1677_v25 = vsub.s32 (!%p197_p10), 6, %v1647_v6 }
  0x16   : > { %s1638_s26 = scalar_select %p239_p11, %s1543_s15, 1 }
  0x17   : > { %s1246_s15 = scalar_lea.sflag [#allocation5], %s235_s18 }
  0x18   : > { %s1379_s27 = sshll.u32 %s1638_s26, 3  ;;  %s1406_s4 = sshll.u32 %s1638_s26, 5 }
  0x19   : > { %s254_s30 = scalar_lea.vmem %s1917_s1, %s1379_s27  ;;  %s246_s7 = scalar_lea.vmem %s1916_s0, %s1406_s4 }
  0x1a   : > { %v276_v2 = vld [vmem:[%s254_s30] sm:$0xff]  ;;  %v274_v8 = vld [vmem:[%s246_s7 + $0x10] sm:$0x77]  ;;  %v275_v10 = vld [vmem:[%s246_s7 + $0x18] sm:$0x77]  ;;  %s1380_s8 = sshll.u32 %s1638_s26, 2 }
  0x1b   : > { %280 = vperm.xlu0 %1469, %v276_v2   ;;  %452 = vperm.xlu1 %1471, %v276_v2   ;;  %v306_v13 = vrot.slane %v274_v8, %v1653_v7  ;;  %v272_v14 = vld [vmem:[%s246_s7] sm:$0x77]  ;;  %v310_v15 = vrot.slane %v274_v8, %v1656_v9  ;;  %v314_v16 = vrot.slane %v275_v10, %v1653_v7  ;;  %v273_v18 = vld [vmem:[%s246_s7 + $0x8] sm:$0x77]  ;;  %s261_s11 = scalar_lea.vmem %s1918_s2, %s1380_s8  ;;  %s1262_s26 = sshll.u32 %s237_s21, 4  ;;  %s1869_s26 = int_to_ptr.vmem [resolvable:$true] %s1262_s26 }
  0x1c   : > { %v318_v17 = vrot.slane %v275_v10, %v1656_v9  ;;  %v374_v19 = vrot.slane %v272_v14, %v1659_v11  ;;  %v378_v20 = vrot.slane %v272_v14, %v1662_v12  ;;  %v382_v21 = vrot.slane %v273_v18, %v1659_v11  ;;  %s1473_s30 = scalar_lea.vmem %s1869_s26, 512  ;;  %s1559_s4 = smov [#allocation4]  }
  0x1d   : > { %v386_v22 = vrot.slane %v273_v18, %v1662_v12  ;;  %v346_v24 = vrot.slane %v306_v13, %v1653_v7  ;;  %v294_v26 = vrot.slane %v272_v14, %v1656_v9  ;;  %v350_v27 = vrot.slane %v310_v15, %v1653_v7  ;;  %p1474_p12 = scmp.ne.s32.totalorder %s1869_s26, %s1473_s30  ;;  %s1477_s5 = sshll.u32 %s1559_s4, 4  ;;  %s1478_s5 = int_to_ptr.vmem [resolvable:$false] %s1477_s5 }
  0x1e   : > { %v354_v28 = vrot.slane %v314_v16, %v1653_v7  ;;  %v358_v29 = vrot.slane %v318_v17, %v1653_v7  ;;  %v390_v30 = vrot.slane %v274_v8, %v1659_v11  ;;  %v394_v31 = vrot.slane %v274_v8, %v1662_v12  ;;  %s1479_s6 = scalar_lea.vmem %s1478_s5, 1024  ;;  %p1480_p1 = scmp.lt.s32.totalorder %s1869_s26, %s1478_s5 }
  0x1f   : > { %1470 = vset.pattern.permute.xlu0 %v1555_v3  ;;  %v398_v32 = vrot.slane %v275_v10, %v1659_v11  ;;  %v402_v33 = vrot.slane %v275_v10, %v1662_v12  ;;  %v414_v34 = vrot.slane %v374_v19, %v1659_v11  ;;  %v418_v35 = vrot.slane %v378_v20, %v1659_v11  ;;  %p1475_p13 = pnand %p1474_p12, %p1620_p4  ;;  %p1481_p2 = scmp.lt.s32.totalorder %s1479_s6, %s1473_s30 }
  0x20   : > { %368 = vperm.xlu0 %1470, %v276_v2   ;;  %v422_v36 = vrot.slane %v382_v21, %v1659_v11  ;;  %v426_v37 = vrot.slane %v386_v22, %v1659_v11  ;;  %v458_v38 = vrot.slane %v272_v14, %v1673_v23  ;;  %v462_v39 = vrot.slane %v272_v14, %v1677_v25 }
  0x21   : > { %v466_v40 = vrot.slane %v273_v18, %v1673_v23  ;;  %v470_v41 = vrot.slane %v273_v18, %v1677_v25  ;;  %v474_v42 = vrot.slane %v274_v8, %v1673_v23  ;;  %v478_v43 = vrot.slane %v274_v8, %v1677_v25  ;;  %p1476_p0 = pneg %p1475_p13  ;;  %p1482_p3 = por %p1481_p2, %p1480_p1 }
  0x22   : > { %v482_v44 = vrot.slane %v275_v10, %v1673_v23  ;;  %v486_v45 = vrot.slane %v275_v10, %v1677_v25  ;;  %v302_v46 = vrot.slane %v273_v18, %v1656_v9  ;;  %v430_v47 = vrot.slane %v390_v30, %v1659_v11 }
  0x23   : > { %v434_v48 = vrot.slane %v394_v31, %v1659_v11  ;;  %v290_v49 = vrot.slane %v272_v14, %v1653_v7  ;;  %v298_v50 = vrot.slane %v273_v18, %v1653_v7  ;;  %v438_v51 = vrot.slane %v398_v32, %v1659_v11  ;;  %p1483_p5 = pnand %p1482_p3, %p1476_p0 }
  0x24   : > { %1472 = vset.pattern.permute.xlu0 %v1554_v1  ;;  %v442_v52 = vrot.slane %v402_v33, %v1659_v11  ;;  %v498_v53 = vrot.slane %v458_v38, %v1673_v23  ;;  %v334_v54 = vrot.slane %v294_v26, %v1653_v7  ;;  %v502_v55 = vrot.slane %v462_v39, %v1673_v23 }
  0x25   : > { %v506_v56 = vrot.slane %v466_v40, %v1673_v23  ;;  %v510_v57 = vrot.slane %v470_v41, %v1673_v23  ;;  %v514_v58 = vrot.slane %v474_v42, %v1673_v23  ;;  %v518_v59 = vrot.slane %v478_v43, %v1673_v23 }
  0x26   : > { %v522_v60 = vrot.slane %v482_v44, %v1673_v23  ;;  %v526_v61 = vrot.slane %v486_v45, %v1673_v23  ;;  %v342_v62 = vrot.slane %v302_v46, %v1653_v7  ;;  %v330_v2 = vrot.slane %v290_v49, %v1653_v7 }
  0x27   : > { %v338_v3 = vrot.slane %v298_v50, %v1653_v7 }
  0x9a   : > { %v281_v63 = vpop.permute.xlu0 %280  ;;  %v453_v1 = vpop.permute.xlu1 %452 }
  0x9b   : > { %v363_v5 = vsub.f32 %v281_v63, %v346_v24  ;;  %v364_v8 = vsub.f32 %v281_v63, %v350_v27  ;;  %v365_v10 = vsub.f32 %v281_v63, %v354_v28  ;;  %v366_v13 = vsub.f32 %v281_v63, %v358_v29 }
  0x9c   : > { %v527_v14 = vsub.f32 %v453_v1, %v498_v53  ;;  %v528_v15 = vsub.f32 %v453_v1, %v502_v55  ;;  %v529_v16 = vsub.f32 %v453_v1, %v506_v56  ;;  %v530_v17 = vsub.f32 %v453_v1, %v510_v57 }
  0x9d   : > { %v539_v18 = vmul.f32 %v363_v5, %v363_v5  ;;  %v540_v19 = vmul.f32 %v364_v8, %v364_v8  ;;  %v541_v20 = vmul.f32 %v365_v10, %v365_v10  ;;  %v542_v21 = vmul.f32 %v366_v13, %v366_v13 }
  0x9e   : > { %v531_v22 = vsub.f32 %v453_v1, %v514_v58  ;;  %v532_v26 = vsub.f32 %v453_v1, %v518_v59  ;;  %v533_v30 = vsub.f32 %v453_v1, %v522_v60  ;;  %v534_v31 = vsub.f32 %v453_v1, %v526_v61 }
  0x9f   : > { %v369_v32 = vpop.permute.xlu0 %368  ;;  %v559_v33 = vmul.f32 %v527_v14, %v527_v14  ;;  %v561_v38 = vmul.f32 %v529_v16, %v529_v16  ;;  %v360_v39 = vsub.f32 %v281_v63, %v334_v54  ;;  %v560_v24 = vmul.f32 %v528_v15, %v528_v15 }
  0xa0   : > { %v443_v27 = vsub.f32 %v369_v32, %v414_v34  ;;  %v444_v28 = vsub.f32 %v369_v32, %v418_v35  ;;  %v445_v29 = vsub.f32 %v369_v32, %v422_v36  ;;  %v446_v40 = vsub.f32 %v369_v32, %v426_v37 }
  0xa1   : > { %v447_v41 = vsub.f32 %v369_v32, %v430_v47  ;;  %v448_v42 = vsub.f32 %v369_v32, %v434_v48  ;;  %v449_v43 = vsub.f32 %v369_v32, %v438_v51  ;;  %v450_v44 = vsub.f32 %v369_v32, %v442_v52 }
  0xa2   : > { %v543_v45 = vmul.f32 %v443_v27, %v443_v27  ;;  %v544_v46 = vmul.f32 %v444_v28, %v444_v28  ;;  %v545_v49 = vmul.f32 %v445_v29, %v445_v29  ;;  %v546_v50 = vmul.f32 %v446_v40, %v446_v40 }
  0xa3   : > { %v547_v53 = vmul.f32 %v447_v41, %v447_v41  ;;  %v548_v55 = vmul.f32 %v448_v42, %v448_v42  ;;  %v549_v56 = vmul.f32 %v449_v43, %v449_v43  ;;  %v550_v57 = vmul.f32 %v450_v44, %v450_v44 }
  0xa4   : > { %v563_v58 = vmul.f32 %v531_v22, %v531_v22  ;;  %v564_v59 = vmul.f32 %v532_v26, %v532_v26  ;;  %v565_v54 = vmul.f32 %v533_v30, %v533_v30  ;;  %v566_v60 = vmul.f32 %v534_v31, %v534_v31 }
  0xa5   : > { %v555_v34 = vadd.f32 %v547_v53, %v539_v18  ;;  %v556_v35 = vadd.f32 %v548_v55, %v540_v19  ;;  %v557_v36 = vadd.f32 %v549_v56, %v541_v20  ;;  %v558_v37 = vadd.f32 %v550_v57, %v542_v21 }
  0xa6   : > { %v536_v47 = vmul.f32 %v360_v39, %v360_v39  ;;  %v362_v48 = vsub.f32 %v281_v63, %v342_v62  ;;  %v562_v51 = vmul.f32 %v530_v17, %v530_v17  ;;  %v359_v52 = vsub.f32 %v281_v63, %v330_v2 }
  0xa7   : > { %v1718_v61 = vadd.f32 %v563_v58, %v555_v34  ;;  %v1720_v1 = vadd.f32 %v565_v54, %v557_v36  ;;  %v361_v5 = vsub.f32 %v281_v63, %v338_v3  ;;  %v572_v8 = vadd.f32 %v564_v59, %v556_v35 }
  0xa8   : > { %v552_v10 = vadd.f32 %v544_v46, %v536_v47  ;;  %v538_v13 = vmul.f32 %v362_v48, %v362_v48  ;;  %v535_v14 = vmul.f32 %v359_v52, %v359_v52  ;;  %v1722_v15 = vadd.f32 %v566_v60, %v558_v37 }
  0xa9   : > { %v537_v16 = vmul.f32 %v361_v5, %v361_v5  ;;  %v605_v18 = vrot.slane %v572_v8, 4  ;;  %v599_v19 = vrot.slane %v1718_v61, 4  ;;  %v611_v20 = vrot.slane %v1720_v1, 4 }
  0xaa   : > { %v568_v62 = vadd.f32 %v560_v24, %v552_v10  ;;  %v554_v17 = vadd.f32 %v546_v50, %v538_v13  ;;  %v551_v2 = vadd.f32 %v543_v45, %v535_v14  ;;  %v617_v21 = vrot.slane %v1722_v15, 4 }
  0xab   : > { %v553_v22 = vadd.f32 %v545_v49, %v537_v16  ;;  %v606_v26 = vmin.f32 %v572_v8, %v605_v18  ;;  %v600_v63 = vmin.f32 %v1718_v61, %v599_v19  ;;  %v612_v3 = vmin.f32 %v1720_v1, %v611_v20 }
  0xac   : > { %v581_v30 = vrot.slane %v568_v62, 4  ;;  %v570_v31 = vadd.f32 %v562_v51, %v554_v17  ;;  %v567_v32 = vadd.f32 %v559_v33, %v551_v2  ;;  %v618_v39 = vmin.f32 %v1722_v15, %v617_v21 }
  0xad   : > { %v1730_v27 = vadd.f32 %v561_v38, %v553_v22  ;;  %v607_v28 = vrot.slane %v606_v26, 2  ;;  %v601_v29 = vrot.slane %v600_v63, 2  ;;  %v613_v24 = vrot.slane %v612_v3, 2 }
  0xae   : > { %v582_v40 = vmin.f32 %v568_v62, %v581_v30  ;;  %v593_v41 = vrot.slane %v570_v31, 4  ;;  %v575_v42 = vrot.slane %v567_v32, 4  ;;  %v619_v43 = vrot.slane %v618_v39, 2 }
  0xaf   : > { %v587_v44 = vrot.slane %v1730_v27, 4  ;;  %v608_v45 = vmin.f32 %v606_v26, %v607_v28  ;;  %v602_v46 = vmin.f32 %v600_v63, %v601_v29  ;;  %v614_v49 = vmin.f32 %v612_v3, %v613_v24 }
  0xb0   : > { %v583_v50 = vrot.slane %v582_v40, 2  ;;  %v594_v53 = vmin.f32 %v570_v31, %v593_v41  ;;  %v576_v55 = vmin.f32 %v567_v32, %v575_v42  ;;  %v620_v33 = vmin.f32 %v618_v39, %v619_v43 }
  0xb1   : > { %v588_v56 = vmin.f32 %v1730_v27, %v587_v44  ;;  %v609_v38 = vrot.slane %v608_v45, 1  ;;  %v603_v57 = vrot.slane %v602_v46, 1  ;;  %v615_v58 = vrot.slane %v614_v49, 1 }
  0xb2   : > { %v584_v59 = vmin.f32 %v582_v40, %v583_v50  ;;  %v595_v54 = vrot.slane %v594_v53, 2  ;;  %v577_v60 = vrot.slane %v576_v55, 2  ;;  %v621_v34 = vrot.slane %v620_v33, 1 }
  0xb3   : > { %v589_v35 = vrot.slane %v588_v56, 2  ;;  %v1734_v36 = vmin.f32 %v608_v45, %v609_v38  ;;  %v1736_v37 = vmin.f32 %v602_v46, %v603_v57  ;;  %v1557_v47 = vmov inf  }
  0xb4   : > { %v1740_v48 = vrot.slane %v1557_v47, %v1673_v23  ;;  %v585_v51 = vrot.slane %v584_v59, 1  ;;  %v596_v52 = vmin.f32 %v594_v53, %v595_v54  ;;  %v578_v5 = vmin.f32 %v576_v55, %v577_v60 }
  0xb5   : > { %v1742_v10 = vmin.f32 %v620_v33, %v621_v34  ;;  %v590_v13 = vmin.f32 %v588_v56, %v589_v35  ;;  %vm630_vm0 = vcmp.le.f32.partialorder %v572_v8, %v1734_v36  ;;  %v1745_v14 = vmin.f32 %v614_v49, %v615_v58 }
  0xb6   : > { %v1749_v16 = vrot.slane %v1557_v47, %v1659_v11  ;;  %v1751_v18 = vmin.f32 %v584_v59, %v585_v51  ;;  %v597_v19 = vrot.slane %v596_v52, 1  ;;  %v579_v20 = vrot.slane %v578_v5, 1 }
  0xb7   : > { %v638_v23 = vsel %vm630_vm0, %v1647_v6, 8  ;;  %v591_v17 = vrot.slane %v590_v13, 1  ;;  %vm632_vm1 = vcmp.le.f32.partialorder %v1722_v15, %v1742_v10  ;;  %vm629_vm2 = vcmp.le.f32.partialorder %v1718_v61, %v1736_v37 }
  0xb8   : > { %v686_v2 = vrot.slane %v638_v23, 4  ;;  %vm626_vm3 = vcmp.le.f32.partialorder %v568_v62, %v1751_v18  ;;  %v1759_v8 = vmin.f32 %v596_v52, %v597_v19  ;;  %v1761_v11 = vmin.f32 %v578_v5, %v579_v20  ;;  %v277_v20 = vld [vmem:[%s261_s11] sm:$0xf] }
  0xb9   : > { %v640_v21 = vsel %vm632_vm1, %v1647_v6, 8  ;;  %v634_v22 = vsel %vm626_vm3, %v1647_v6, 8  ;;  %v1765_v26 = vmin.f32 %v590_v13, %v591_v17  ;;  %vm631_vm8 = vcmp.le.f32.partialorder %v1720_v1, %v1745_v14 }
  0xba   : > { %vm687_vm4 = vcmp.lt.s32.totalorder %v638_v23, %v686_v2  ;;  %v704_v63 = vrot.slane %v640_v21, 4  ;;  %v650_v3 = vrot.slane %v634_v22, 4  ;;  %vm628_vm5 = vcmp.le.f32.partialorder %v570_v31, %v1759_v8 }
  0xbb   : > { %vm625_vm6 = vcmp.le.f32.partialorder %v567_v32, %v1761_v11  ;;  %v688_v15 = vsel %vm687_vm4, %v638_v23, %v686_v2  ;;  %v636_v62 = vsel %vm628_vm5, %v1647_v6, 8  ;;  %vm627_vm7 = vcmp.le.f32.partialorder %v1730_v27, %v1765_v26 }
  0xbc   : > { %v633_v30 = vsel %vm625_vm6, %v1647_v6, 8  ;;  %v689_v39 = vrot.slane %v688_v15, 2  ;;  %vm651_vm9 = vcmp.lt.s32.totalorder %v634_v22, %v650_v3  ;;  %v668_v28 = vrot.slane %v636_v62, 4 }
  0xbd   : > { %v641_v29 = vrot.slane %v633_v30, 4  ;;  %v635_v24 = vsel %vm627_vm7, %v1647_v6, 8  ;;  %v652_v31 = vsel %vm651_vm9, %v634_v22, %v650_v3  ;;  %vm1776_vm11 = vcmp.lt.s32.totalorder %v640_v21, %v704_v63 }
  0xbe   : > { %v659_v40 = vrot.slane %v635_v24, 4  ;;  %vm690_vm10 = vcmp.lt.s32.totalorder %v688_v15, %v689_v39  ;;  %v653_v41 = vrot.slane %v652_v31, 2  ;;  %vm669_vm12 = vcmp.lt.s32.totalorder %v636_v62, %v668_v28 }
  0xbf   : > { %vm642_vm13 = vcmp.lt.s32.totalorder %v633_v30, %v641_v29  ;;  %v691_v27 = vsel %vm690_vm10, %v688_v15, %v689_v39  ;;  %v670_v42 = vsel %vm669_vm12, %v636_v62, %v668_v28  ;;  %v637_v55 = vsel %vm629_vm2, %v1647_v6, 8 }
  0xc0   : > { %v643_v43 = vsel %vm642_vm13, %v633_v30, %v641_v29  ;;  %vm660_vm14 = vcmp.lt.s32.totalorder %v635_v24, %v659_v40  ;;  %v692_v44 = vrot.slane %v691_v27, 1  ;;  %vm654_vm0 = vcmp.lt.s32.totalorder %v652_v31, %v653_v41 }
  0xc1   : > { %v671_v45 = vrot.slane %v670_v42, 2  ;;  %v644_v46 = vrot.slane %v643_v43, 2  ;;  %v661_v49 = vsel %vm660_vm14, %v635_v24, %v659_v40  ;;  %v655_v50 = vsel %vm654_vm0, %v652_v31, %v653_v41 }
  0xc2   : > { %v662_v53 = vrot.slane %v661_v49, 2  ;;  %vm693_vm1 = vcmp.lt.s32.totalorder %v691_v27, %v692_v44  ;;  %v656_v33 = vrot.slane %v655_v50, 1  ;;  %v706_v56 = vsel %vm1776_vm11, %v640_v21, %v704_v63 }
  0xc3   : > { %vm672_vm3 = vcmp.lt.s32.totalorder %v670_v42, %v671_v45  ;;  %vm645_vm4 = vcmp.lt.s32.totalorder %v643_v43, %v644_v46  ;;  %v694_v58 = vsel %vm693_vm1, %v691_v27, %v692_v44  ;;  %v707_v35 = vrot.slane %v706_v56, 2 }
  0xc4   : > { %v673_v38 = vsel %vm672_vm3, %v670_v42, %v671_v45  ;;  %v646_v57 = vsel %vm645_vm4, %v643_v43, %v644_v46  ;;  %vm663_vm5 = vcmp.lt.s32.totalorder %v661_v49, %v662_v53  ;;  %vm657_vm6 = vcmp.lt.s32.totalorder %v655_v50, %v656_v33 }
  0xc5   : > { %v674_v59 = vrot.slane %v673_v38, 1  ;;  %v647_v54 = vrot.slane %v646_v57, 1  ;;  %v664_v60 = vsel %vm663_vm5, %v661_v49, %v662_v53  ;;  %v658_v61 = vsel %vm657_vm6, %v655_v50, %v656_v33 }
  0xc6   : > { %v665_v34 = vrot.slane %v664_v60, 1  ;;  %v677_v51 = vrot.slane %v637_v55, 4  ;;  %vm714_vm2 = vcmp.eq.s32.totalorder %v1647_v6, %v658_v61  ;;  %v639_v52 = vsel %vm631_vm8, %v1647_v6, 8 }
  0xc7   : > { %vm675_vm7 = vcmp.lt.s32.totalorder %v673_v38, %v674_v59  ;;  %vm648_vm9 = vcmp.lt.s32.totalorder %v646_v57, %v647_v54  ;;  %v1558_v5 = vmov 1.0   ;;  %vm708_vm11 = vcmp.lt.s32.totalorder %v706_v56, %v707_v35 }
  0xc8   : > { %1389 = vmatprep.subr.msk.mxu0 %vm714_vm2, %v1558_v5  ;;  %v676_v13 = vsel %vm675_vm7, %v673_v38, %v674_v59  ;;  %v649_v19 = vsel %vm648_vm9, %v646_v57, %v647_v54  ;;  %vm666_vm10 = vcmp.lt.s32.totalorder %v664_v60, %v665_v34  ;;  %v709_v17 = vsel %vm708_vm11, %v706_v56, %v707_v35 }
  0xc9   : > { %vm716_vm12 = vcmp.eq.s32.totalorder %v1647_v6, %v676_v13  ;;  %vm713_vm13 = vcmp.eq.s32.totalorder %v1647_v6, %v649_v19  ;;  %v667_v23 = vsel %vm666_vm10, %v664_v60, %v665_v34  ;;  %v710_v2 = vrot.slane %v709_v17, 1 }
  0xca   : > { %1392 = vmatprep.subr.msk.mxu1 %vm716_vm12, %v1558_v5  ;;  %1390 = vmatpush1.msk.msra.mxu0 %vm713_vm13, %v1558_v5  ;;  %vm715_vm14 = vcmp.eq.s32.totalorder %v1647_v6, %v667_v23  ;;  %vm678_vm0 = vcmp.lt.s32.totalorder %v637_v55, %v677_v51  ;;  %v695_v1 = vrot.slane %v639_v52, 4  ;;  %vm718_vm8 = vcmp.eq.s32.totalorder %v1647_v6, %v694_v58 }
  0xcb   : > { %1393 = vmatpush1.msk.msra.mxu1 %vm715_vm14, %v1558_v5  ;;  %1391 = vmatmul.mubr.msk.f32.vlgmr.msra.gmra.mrb[0].mxu0 %vm737_vm15, %v277_v20  ;;  %v679_v21 = vsel %vm678_vm0, %v637_v55, %v677_v51  ;;  %vm1069_vm1 = vcmp.lt.f32.partialorder %v1765_v26, %v1740_v48  ;;  %vm711_vm3 = vcmp.lt.s32.totalorder %v709_v17, %v710_v2 }
  0xcc   : > { %1394 = vmatmul.mubr.msk.f32.vlgmr.msra.gmra.mrb[0].mxu1 %vm737_vm15, %v277_v20  ;;  %1395 = vmatprep.subr.msk.mxu0 %vm718_vm8, %v1558_v5  ;;  %v680_v22 = vrot.slane %v679_v21, 2  ;;  %vm696_vm4 = vcmp.lt.s32.totalorder %v639_v52, %v695_v1  ;;  %v712_v63 = vsel %vm711_vm3, %v709_v17, %v710_v2  ;;  %v1046_v15 = vrot.slane %v1557_v47, %v1656_v9 }
  0xcd   : > { %v697_v3 = vsel %vm696_vm4, %v639_v52, %v695_v1  ;;  %947 = vmatprep.mubr.f32.mxu0 %v1556_v4  ;;  %1018 = vmatprep.mubr.f32.mxu1 %v1556_v4  ;;  %vm720_vm5 = vcmp.eq.s32.totalorder %v1647_v6, %v712_v63  ;;  %vm1068_vm2 = vcmp.lt.f32.partialorder %v1751_v18, %v1749_v16  ;;  %v1148_v27 = vsel %vm1069_vm1, 1, %v1553_v0 }
  0xce   : > { %vm681_vm6 = vcmp.lt.s32.totalorder %v679_v21, %v680_v22  ;;  %v698_v62 = vrot.slane %v697_v3, 2  ;;  %1398 = vmatprep.subr.msk.mxu1 %vm720_vm5, %v1558_v5  ;;  %v1054_v39 = vrot.slane %v1557_v47, %v1677_v25  ;;  %vm1071_vm9 = vcmp.lt.f32.partialorder %v1736_v37, %v1046_v15 }
  0xcf   : > { %v682_v30 = vsel %vm681_vm6, %v679_v21, %v680_v22  ;;  %v1050_v9 = vrot.slane %v1557_v47, %v1662_v12  ;;  %v1041_v12 = vsub.s32 3, %v1647_v6  ;;  %v1030_v25 = vrot.slane %v1557_v47, %v1653_v7 }
  0xd0   : > { %v683_v28 = vrot.slane %v682_v30, 1  ;;  %vm699_vm7 = vcmp.lt.s32.totalorder %v697_v3, %v698_v62  ;;  %vm1073_vm11 = vcmp.lt.f32.partialorder %v1745_v14, %v1054_v39  ;;  %v1147_v42 = vsel %vm1068_vm2, 1, %v1553_v0 }
  0xd1   : > { %v700_v29 = vsel %vm699_vm7, %v697_v3, %v698_v62  ;;  %vm1072_vm14 = vcmp.lt.f32.partialorder %v1734_v36, %v1050_v9  ;;  %v1042_v32 = vrot.slane %v1557_v47, %v1041_v12  ;;  %vm1067_vm8 = vcmp.lt.f32.partialorder %v1761_v11, %v1030_v25 }
  0xd2   : > { %vm684_vm10 = vcmp.lt.s32.totalorder %v682_v30, %v683_v28  ;;  %v701_v24 = vrot.slane %v700_v29, 1  ;;  %v1146_v41 = vsel %vm1067_vm8, 1, %v1553_v0  ;;  %v1057_v11 = vsub.s32 7, %v1647_v6 }
  0xd3   : > { %v685_v31 = vsel %vm684_vm10, %v682_v30, %v683_v28  ;;  %vm1070_vm3 = vcmp.lt.f32.partialorder %v1759_v8, %v1042_v32  ;;  %v1157_v44 = vrot.slane %v1146_v41, %v1653_v7  ;;  %v1165_v8 = vrot.slane %v1148_v27, %v1653_v7 }
  0xd4   : > { %vm717_vm12 = vcmp.eq.s32.totalorder %v1647_v6, %v685_v31  ;;  %vm702_vm13 = vcmp.lt.s32.totalorder %v700_v29, %v701_v24  ;;  %v1149_v43 = vsel %vm1070_vm3, 1, %v1553_v0  ;;  %v1161_v45 = vrot.slane %v1147_v42, %v1653_v7 }
  0xd5   : > { %1396 = vmatpush1.msk.msra.mxu0 %vm717_vm12, %v1558_v5  ;;  %v703_v40 = vsel %vm702_vm13, %v700_v29, %v701_v24  ;;  %v1198_v48 = vcombine.high %v1556_v4, %v1556_v4  ;;  %v1169_v26 = vrot.slane %v1149_v43, %v1653_v7  ;;  %v1058_v18 = vrot.slane %v1557_v47, %v1057_v11 }
  0xd6   : > { %vm719_vm0 = vcmp.eq.s32.totalorder %v1647_v6, %v703_v40  ;;  %1397 = vmatmul.mubr.msk.f32.vlgmr.msra.gmra.mrb[2].mxu0 %vm737_vm15, %v277_v20  ;;  %vm1188_vm1 = vcmp.eq.s32.totalorder %v1165_v8, 1  ;;  %vm1187_vm4 = vcmp.eq.s32.totalorder %v1161_v45, 1  ;;  %v1150_v38 = vsel %vm1071_vm9, 1, %v1553_v0 }
  0xd7   : > { %1399 = vmatpush1.msk.msra.mxu1 %vm719_vm0, %v1558_v5  ;;  %vm1189_vm5 = vcmp.eq.s32.totalorder %v1169_v26, 1  ;;  %vm1074_vm6 = vcmp.lt.f32.partialorder %v1742_v10, %v1058_v18  ;;  %v1151_v47 = vsel %vm1072_vm14, 1, %v1553_v0  ;;  %v1152_v57 = vsel %vm1073_vm11, 1, %v1553_v0 }
  0xd8   : > { %1400 = vmatmul.mubr.msk.f32.vlgmr.msra.gmra.mrb[2].mxu1 %vm737_vm15, %v277_v20  ;;  %vm1186_vm15 = vcmp.eq.s32.totalorder %v1157_v44, 1  ;;  %v1173_v58 = vrot.slane %v1150_v38, %v1653_v7  ;;  %v1153_v59 = vsel %vm1074_vm6, 1, %v1553_v0  ;;  %v1177_v37 = vrot.slane %v1151_v47, %v1653_v7 }
  0xd9   : > { %v1181_v10 = vrot.slane %v1152_v57, %v1653_v7  ;;  %v1185_v54 = vrot.slane %v1153_v59, %v1653_v7 }
  0xda   : > { %vm1190_vm2 = vcmp.eq.s32.totalorder %v1173_v58, 1  ;;  %vm1191_vm7 = vcmp.eq.s32.totalorder %v1177_v37, 1 }
  0xdb   : > { %vm1192_vm9 = vcmp.eq.s32.totalorder %v1181_v10, 1  ;;  %vm1193_vm10 = vcmp.eq.s32.totalorder %v1185_v54, 1 }
 0x19e   : > { %v807_v16 = vpop.f32.mrb[0].mxu0 }
 0x19f   : > { %v1206_v46 = vsel %vm1186_vm15, %v807_v16, 0.0  ;;  %v878_v49 = vpop.f32.mrb[0].mxu1  ;;  %v809_v50 = vpop.f32.mrb[1].mxu0 }
 0x1a0   : > { %v1208_v6 = vsel %vm1188_vm1, %v878_v49, 0.0  ;;  %v1207_v53 = vsel %vm1187_vm4, %v809_v50, %v1198_v48  ;;  %v880_v55 = vpop.f32.mrb[1].mxu1 }
 0x1a1   : > { %v1222_v33 = vcombine.low %v1206_v46, %v1207_v53  ;;  %v1209_v56 = vsel %vm1189_vm5, %v880_v55, %v1198_v48 }
 0x1a2   : > { %v1223_v4 = vcombine.low %v1208_v6, %v1209_v56 }
 0x1a3   : > { %1241 = vst [vmem:[%s237_s21] sm:$0xff] %v1222_v33 }
 0x1a4   : > { %1242 = vst [vmem:[%s237_s21 + $0x8] sm:$0xff] %v1223_v4 }
 0x1a9   : > { %v949_v60 = vpop.f32.mrb[2].mxu0 }
 0x1aa   : > { %v1210_v36 = vsel %vm1190_vm2, %v949_v60, 0.0  ;;  %v951_v61 = vpop.f32.mrb[3].mxu0 }
 0x1ab   : > { %v1020_v34 = vpop.f32.mrb[2].mxu1  ;;  %v1211_v14 = vsel %vm1191_vm7, %v951_v61, %v1198_v48 }
 0x1ac   : > { %v1212_v35 = vsel %vm1192_vm9, %v1020_v34, 0.0  ;;  %v1224_v0 = vcombine.low %v1210_v36, %v1211_v14  ;;  %v1022_v51 = vpop.f32.mrb[3].mxu1 }
 0x1ad   : > { %v1213_v52 = vsel %vm1193_vm10, %v1022_v51, %v1198_v48 }
 0x1ae   : > { %1243 = vst [vmem:[%s237_s21 + $0x10] sm:$0xff] %v1224_v0  ;;  %v1225_v5 = vcombine.low %v1212_v35, %v1213_v52 }
 0x1b0   : > { %1244 = vst [vmem:[%s237_s21 + $0x18] sm:$0xff] %v1225_v5 }
 0x1b1   : > { %1486 = shalt.err (!%p1483_p5)
}
 0x1b2   : > { %s1487_s7 = scalar_lea.hbm %s1867_s29, 512  ;;  %s1491_s10 = scalar_lea.hbm %s1919_s3, 1024 }
 0x1b3   : > { %p1488_p6 = scmp.ne.s32.totalorder %s1867_s29, %s1487_s7  ;;  %p1492_p10 = scmp.lt.u32.totalorder %s1867_s29, %s1919_s3 }
 0x1b4   : > { %p1493_p11 = scmp.lt.u32.totalorder %s1491_s10, %s1487_s7  ;;  %p1495_p13 = scmp.lt.u32.totalorder %s1487_s7, %s1867_s29 }
 0x1b5   : > { %p1489_p7 = pnand %p1488_p6, %p1620_p4 }
 0x1b6   : > { %p1494_p12 = por %p1493_p11, %p1492_p10 }
 0x1b7   : > { %p1490_p9 = pneg %p1489_p7 }
 0x1b8   : > { %p1496_p0 = por %p1495_p13, %p1494_p12 }
 0x1ba   : > { %p1497_p1 = pnand %p1496_p0, %p1490_p9 }
 0x1bc   : > { %1500 = shalt.err (!%p1497_p1)
}
 0x1bd   : > { %1408 = dma.vmem_to_hbm [thread:$0]  (%p1620_p4), %s1869_s26, 512, %s1867_s29, %s1246_s15  }
 0x1be PF: > { %p1414_p2 = scmp.ge.s32.totalorder %s1551_s17, 2  ;;  %s1274_s19 = sand.u32 1, %s1531_s12  }
 0x1bf   : > { %s1275_s21 = scalar_lea.sflag [#allocation5], %s1274_s19 }
 0x1c0   : > { %p1411_p3 = pnand %p1414_p2, %p1627_p8 }
 0x1c2   : > { %1526 = dma.done.wait (!%p1411_p3), %s1275_s21, 512  }
 0x1c3   : > { %1528 = vsyncadd (!%p1411_p3), %s1275_s21, 4294966784  ;;  %s16_s17 = sadd.s32 1, %s1551_s17   ;;  %s1924_s12 = smov %s1535_s13 }
 0x1c4   : > { %p13_p5 = scmp.ge.s32.totalorder %s16_s17, 4   ;;  %s1925_s13 = smov %s1539_s14 }
 0x1c5   : > { %s1926_s14 = smov %s1633_s25  ;;  %s1927_s15 = smov %s1547_s16 }
 0x1c6   : > { %s1928_s16 = smov %s1930_s20  ;;  %15 = sbr.rel (!%p13_p5) target bundleno = 4 (0x4), region = 81 }
 0x1cd   :  { %1280 = vsyncpa [#allocation5], 1 }
 0x1ce   :  { %1282 = vsyncpa [#allocation5 + $0x1], 1 }

</bundles_post_ra>
